<compile_context>
chip_gen: v5e
topology: v5e:2x2
jax: 0.10.0
libtpu: 0.0.40
codegen_flags: <defaults>
</compile_context>

<pallas_src>
import jax
import jax.numpy as jnp
from jax import lax
from jax.experimental import pallas as pl
from jax.experimental.pallas import tpu as pltpu


def _round_up(n, m):
    return ((n + m - 1) // m) * m


# ~0.35 us fixed per-grid-step pipeline overhead expressed as an equivalent
# number of "dead" batch rows of 4-layer MLP work (mid-point across v5e..v7x).
_STEP_OVERHEAD_ROWS = 512
# Per-step working-set budget (conservative vs v7x's 64 MiB physical VMEM).
_VMEM_TB_BUDGET = 40 * 1024 * 1024
_VMEM_LIMIT_CAP = 48 * 1024 * 1024


def _vmem_bytes_estimate(tb, s, a, h, weight_bytes):
    """Rough per-step VMEM working set for a (tb, *) batch tile."""
    inputs = 2 * tb * (s + a) * 4          # double-buffered f32 state/action tiles
    output = 2 * tb * 4                    # double-buffered (1, tb) f32 q tile
    inter = tb * h * (4 * 4 + 2 * 2)       # ~4 live f32 (tb,H) + bf16 casts
    return inputs + output + inter + 2 * weight_bytes


def _choose_batch_tile(b, s, a, h, weight_bytes):
    """Batch tile: amortize per-step overhead, minimize padding, fit VMEM,
    and keep >=2 grid steps for large B so v7x megacore can split the grid."""
    if b <= 128:
        return _round_up(b, 8)             # single sublane-aligned tile
    best = None
    for tb in (2048, 1024, 512, 256, 128):
        if _vmem_bytes_estimate(tb, s, a, h, weight_bytes) > _VMEM_TB_BUDGET:
            continue
        b_pad = _round_up(b, tb)
        steps = b_pad // tb
        if b >= 512 and steps < 2:
            continue                       # leave >=2 steps for the 2-TC split
        pad = b_pad - b
        key = (pad + steps * _STEP_OVERHEAD_ROWS, pad)
        if best is None or key < best[0]:
            best = (key, tb)
    return best[1] if best is not None else 128


def _critic_kernel(s_ref, a_ref,
                   w1s_ref, w1a_ref, b1_ref,
                   w2_ref, b2_ref,
                   w3_ref, b3_ref,
                   w4_ref, b4_ref,
                   o_ref):
    """Fused 4-layer MLP on one (TB, *) batch tile; all operands in VMEM."""
    cdt = w1s_ref.dtype                    # MXU operand dtype (bf16 or f32)
    s = s_ref[...].astype(cdt)
    a = a_ref[...].astype(cdt)

    # Layer 1: split-K replaces the concat (s @ W1s + a @ W1a), f32 accumulation.
    h = (jnp.dot(s, w1s_ref[...], preferred_element_type=jnp.float32)
         + jnp.dot(a, w1a_ref[...], preferred_element_type=jnp.float32)
         + b1_ref[...])
    h = jnp.maximum(h, 0.0).astype(cdt)

    h = jnp.dot(h, w2_ref[...], preferred_element_type=jnp.float32) + b2_ref[...]
    h = jnp.maximum(h, 0.0).astype(cdt)

    h = jnp.dot(h, w3_ref[...], preferred_element_type=jnp.float32) + b3_ref[...]
    h = jnp.maximum(h, 0.0).astype(cdt)

    # Layer 4: contract H of W4 (1, H) against H of h (TB, H) -> (1, TB).
    # Expressed via dot_general so no (TB, H) transposed copy is materialized;
    # batch lands on the lane axis -> lane-dense, unmasked stores.
    q = lax.dot_general(w4_ref[...], h,
                        dimension_numbers=(((1,), (1,)), ((), ())),
                        preferred_element_type=jnp.float32)
    o_ref[...] = (q + b4_ref[...]).astype(o_ref.dtype)


def prepare_critic_params(params, state_dim, weight_dtype=jnp.bfloat16):
    """One-time param prep: transpose (out,in)->(in,out), split W1, cast dtype.

    Note: with weight_dtype=bf16 activations are re-quantized after every layer,
    so results are close to but not bit-comparable with the f32 PyTorch forward;
    pass weight_dtype=jnp.float32 for parity-critical use.
    """
    (w1, b1), (w2, b2), (w3, b3), (w4, b4) = params
    w1_t = w1.T                                   # (S+A, H)
    f32 = jnp.float32
    return {
        "w1s": w1_t[:state_dim].astype(weight_dtype),   # (S, H)
        "w1a": w1_t[state_dim:].astype(weight_dtype),   # (A, H)
        "b1": b1.reshape(1, -1).astype(f32),
        "w2": w2.T.astype(weight_dtype),                # (H, H)
        "b2": b2.reshape(1, -1).astype(f32),
        "w3": w3.T.astype(weight_dtype),                # (H, H)
        "b3": b3.reshape(1, -1).astype(f32),
        "w4": w4.astype(weight_dtype),                  # (1, H): already row form
        "b4": b4.reshape(1, 1).astype(f32),
    }


_WEIGHT_NAMES = ("w1s", "w1a", "b1", "w2", "b2", "w3", "b3", "w4", "b4")


def critic_forward(state, action, prepared, *, batch_tile=None):
    """q(state, action) -> (B, 1) via one batch-tiled fused Pallas kernel."""
    B, S = state.shape
    A = action.shape[1]
    H = prepared["w2"].shape[0]
    weight_bytes = sum(int(v.size) * jnp.dtype(v.dtype).itemsize
                       for v in prepared.values())

    if batch_tile is not None:
        # Validate user tile against the (8, 128) block constraints.
        TB = max(8, _round_up(int(batch_tile), 8))
        if _round_up(B, TB) != TB:        # multi-tile grid -> lane-dense q blocks
            TB = _round_up(TB, 128)
    else:
        TB = _choose_batch_tile(B, S, A, H, weight_bytes)

    B_pad = _round_up(B, TB)
    if B_pad != B:
        state = jnp.pad(state, ((0, B_pad - B), (0, 0)))
        action = jnp.pad(action, ((0, B_pad - B), (0, 0)))

    grid = (B_pad // TB,)
    resident = lambda i: (0, 0)           # same block every step -> stays in VMEM

    # Single-buffer the VMEM-resident weights when they are big enough for the
    # double-buffer copy to matter against v7x's 64 MiB VMEM; tiny weights keep
    # the default (simpler, identical behavior).
    single_buffer = 2 * weight_bytes > 4 * 1024 * 1024

    def weight_spec(name):
        shape = prepared[name].shape
        if single_buffer:
            return pl.BlockSpec(shape, resident, pipeline_mode=pl.Buffered(1))
        return pl.BlockSpec(shape, resident)

    in_specs = [
        pl.BlockSpec((TB, S), lambda i: (i, 0)),
        pl.BlockSpec((TB, A), lambda i: (i, 0)),
    ] + [weight_spec(n) for n in _WEIGHT_NAMES]
    out_specs = pl.BlockSpec((1, TB), lambda i: (0, i))

    vmem_est = _vmem_bytes_estimate(TB, S, A, H, weight_bytes)
    vmem_limit = min(_VMEM_LIMIT_CAP,
                     max(32 * 1024 * 1024, int(vmem_est * 1.25)))

    flops = 2 * B_pad * ((S + A) * H + H * H + H * H + H)
    bytes_accessed = (int(state.size) + int(action.size) + B_pad) * 4 + weight_bytes

    q_row = pl.pallas_call(
        _critic_kernel,
        grid=grid,
        in_specs=in_specs,
        out_specs=out_specs,
        out_shape=jax.ShapeDtypeStruct((1, B_pad), jnp.float32),
        compiler_params=pltpu.CompilerParams(
            dimension_semantics=("parallel",),
            vmem_limit_bytes=vmem_limit),
        cost_estimate=pl.CostEstimate(flops=flops, transcendentals=0,
                                      bytes_accessed=bytes_accessed),
    )(state, action,
      prepared["w1s"], prepared["w1a"], prepared["b1"],
      prepared["w2"], prepared["b2"],
      prepared["w3"], prepared["b3"],
      prepared["w4"], prepared["b4"])

    return q_row[0, :B].reshape(B, 1)


def init_critic_params(key, state_dim, action_dim, hidden_dim=256):
    """PyTorch-style uniform(-1/sqrt(fan_in), +1/sqrt(fan_in)), (out,in) layout."""
    dims = [(state_dim + action_dim, hidden_dim),
            (hidden_dim, hidden_dim),
            (hidden_dim, hidden_dim),
            (hidden_dim, 1)]
    params = []
    for fan_in, fan_out in dims:
        key, kw, kb = jax.random.split(key, 3)
        bound = 1.0 / jnp.sqrt(fan_in)
        w = jax.random.uniform(kw, (fan_out, fan_in), jnp.float32, -bound, bound)
        b = jax.random.uniform(kb, (fan_out,), jnp.float32, -bound, bound)
        params.append((w, b))
    return params


def critic_reference(state, action, params):
    """Pure-JAX reference of the PyTorch forward."""
    x = jnp.concatenate([state, action], axis=1)
    (w1, b1), (w2, b2), (w3, b3), (w4, b4) = params
    h = jnp.maximum(x @ w1.T + b1, 0.0)
    h = jnp.maximum(h @ w2.T + b2, 0.0)
    h = jnp.maximum(h @ w3.T + b3, 0.0)
    return h @ w4.T + b4


if __name__ == "__main__":
    key = jax.random.PRNGKey(0)

    fwd = jax.jit(critic_forward, static_argnames=("batch_tile",))

    # ---- small shapes consistent with the module ----
    batch, state_dim, action_dim, hidden_dim = 8, 16, 8, 32
    k_params, k_state, k_action, key = jax.random.split(key, 4)
    params = init_critic_params(k_params, state_dim, action_dim, hidden_dim)
    state = jax.random.normal(k_state, (batch, state_dim), jnp.float32)
    action = jax.random.normal(k_action, (batch, action_dim), jnp.float32)
    q_ref = critic_reference(state, action, params)

    # f32-weight path (tight numerical check vs the PyTorch-equivalent math)
    prep_f32 = prepare_critic_params(params, state_dim, weight_dtype=jnp.float32)
    q_f32 = jax.block_until_ready(fwd(state, action, prep_f32))
    assert q_f32.shape == (batch, 1), q_f32.shape
    assert jnp.allclose(q_f32, q_ref, atol=1e-4, rtol=1e-4), (q_f32, q_ref)

    # bf16-weight path (default; relaxed tolerance — not bit-comparable to f32)
    prep_bf16 = prepare_critic_params(params, state_dim)
    q_bf16 = jax.block_until_ready(fwd(state, action, prep_bf16))
    assert q_bf16.shape == (batch, 1), q_bf16.shape
    assert jnp.allclose(q_bf16, q_ref, atol=5e-2, rtol=5e-2), (q_bf16, q_ref)

    # ---- default tile heuristic with batch padding (B=160 -> one 256-row tile) ----
    batch2, sd2, ad2, hd2 = 160, 17, 6, 64
    k_params2, k_state2, k_action2, key = jax.random.split(key, 4)
    params2 = init_critic_params(k_params2, sd2, ad2, hd2)
    state2 = jax.random.normal(k_state2, (batch2, sd2), jnp.float32)
    action2 = jax.random.normal(k_action2, (batch2, ad2), jnp.float32)
    prep2 = prepare_critic_params(params2, sd2)
    q2_ref = critic_reference(state2, action2, params2)
    q2 = jax.block_until_ready(fwd(state2, action2, prep2))
    assert q2.shape == (batch2, 1), q2.shape
    assert jnp.allclose(q2, q2_ref, atol=5e-2, rtol=5e-2), (q2, q2_ref)

    # ---- user-supplied batch_tile: rounded to 8/128 multiples, multi-step grid ----
    q3 = jax.block_until_ready(fwd(state2, action2, prep2, batch_tile=66))
    assert q3.shape == (batch2, 1), q3.shape
    assert jnp.allclose(q3, q2_ref, atol=5e-2, rtol=5e-2), (q3, q2_ref)

    print("KERNEL_OK")
</pallas_src>

<mosaic_0001>
module attributes {stable_mosaic.version = 11 : i64} {
  func.func @_critic_kernel(%arg0: i32, %arg1: memref<8x16xf32, #tpu.memory_space<vmem>>, %arg2: memref<8x8xf32, #tpu.memory_space<vmem>>, %arg3: memref<16x32xf32, #tpu.memory_space<vmem>>, %arg4: memref<8x32xf32, #tpu.memory_space<vmem>>, %arg5: memref<1x32xf32, #tpu.memory_space<vmem>>, %arg6: memref<32x32xf32, #tpu.memory_space<vmem>>, %arg7: memref<1x32xf32, #tpu.memory_space<vmem>>, %arg8: memref<32x32xf32, #tpu.memory_space<vmem>>, %arg9: memref<1x32xf32, #tpu.memory_space<vmem>>, %arg10: memref<1x32xf32, #tpu.memory_space<vmem>>, %arg11: memref<1x1xf32, #tpu.memory_space<vmem>>, %arg12: memref<1x8xf32, #tpu.memory_space<vmem>>) attributes {dimension_semantics = [#tpu.dimension_semantics<parallel>], iteration_bounds = array<i64: 1>, scalar_prefetch = 0 : i64, scratch_operands = 0 : i64, tpu.core_type = #tpu.core_type<tc>, window_params = [{transform_indices = @transform_0, window_bounds = array<i64: 8, 16>}, {transform_indices = @transform_1, window_bounds = array<i64: 8, 8>}, {pipeline_mode = #tpu.pipeline_mode<synchronous>, transform_indices = @transform_2, window_bounds = array<i64: 16, 32>}, {pipeline_mode = #tpu.pipeline_mode<synchronous>, transform_indices = @transform_3, window_bounds = array<i64: 8, 32>}, {pipeline_mode = #tpu.pipeline_mode<synchronous>, transform_indices = @transform_4, window_bounds = array<i64: 1, 32>}, {pipeline_mode = #tpu.pipeline_mode<synchronous>, transform_indices = @transform_5, window_bounds = array<i64: 32, 32>}, {pipeline_mode = #tpu.pipeline_mode<synchronous>, transform_indices = @transform_6, window_bounds = array<i64: 1, 32>}, {pipeline_mode = #tpu.pipeline_mode<synchronous>, transform_indices = @transform_7, window_bounds = array<i64: 32, 32>}, {pipeline_mode = #tpu.pipeline_mode<synchronous>, transform_indices = @transform_8, window_bounds = array<i64: 1, 32>}, {pipeline_mode = #tpu.pipeline_mode<synchronous>, transform_indices = @transform_9, window_bounds = array<i64: 1, 32>}, {pipeline_mode = #tpu.pipeline_mode<synchronous>, transform_indices = @transform_10, window_bounds = array<i64: 1, 1>}, {transform_indices = @transform_11, window_bounds = array<i64: 1, 8>}]} {
    %c0 = arith.constant 0 : index
    %c0_0 = arith.constant 0 : index
    %0 = vector.load %arg1[%c0, %c0_0] : memref<8x16xf32, #tpu.memory_space<vmem>>, vector<8x16xf32>
    %c0_1 = arith.constant 0 : index
    %c0_2 = arith.constant 0 : index
    %1 = vector.load %arg2[%c0_1, %c0_2] : memref<8x8xf32, #tpu.memory_space<vmem>>, vector<8x8xf32>
    %c0_3 = arith.constant 0 : index
    %c0_4 = arith.constant 0 : index
    %2 = vector.load %arg3[%c0_3, %c0_4] : memref<16x32xf32, #tpu.memory_space<vmem>>, vector<16x32xf32>
    %cst = arith.constant dense<0.000000e+00> : vector<8x32xf32>
    %3 = tpu.matmul %0, %2, %cst {dimension_numbers = #tpu.dot_dimension_numbers<[1], [0], [0], [1], [0, 0, 1, 1], [], []>} : vector<8x16xf32>, vector<16x32xf32>, vector<8x32xf32> -> vector<8x32xf32>
    %c0_5 = arith.constant 0 : index
    %c0_6 = arith.constant 0 : index
    %4 = vector.load %arg4[%c0_5, %c0_6] : memref<8x32xf32, #tpu.memory_space<vmem>>, vector<8x32xf32>
    %cst_7 = arith.constant dense<0.000000e+00> : vector<8x32xf32>
    %5 = tpu.matmul %1, %4, %cst_7 {dimension_numbers = #tpu.dot_dimension_numbers<[1], [0], [0], [1], [0, 0, 1, 1], [], []>} : vector<8x8xf32>, vector<8x32xf32>, vector<8x32xf32> -> vector<8x32xf32>
    %6 = arith.addf %3, %5 : vector<8x32xf32>
    %c0_8 = arith.constant 0 : index
    %c0_9 = arith.constant 0 : index
    %7 = vector.load %arg5[%c0_8, %c0_9] : memref<1x32xf32, #tpu.memory_space<vmem>>, vector<1x32xf32>
    %8 = vector.broadcast %7 : vector<1x32xf32> to vector<8x32xf32>
    %9 = arith.addf %6, %8 : vector<8x32xf32>
    %cst_10 = arith.constant 0.000000e+00 : f32
    %10 = vector.broadcast %cst_10 : f32 to vector<8x32xf32>
    %11 = arith.maximumf %9, %10 : vector<8x32xf32>
    %c0_11 = arith.constant 0 : index
    %c0_12 = arith.constant 0 : index
    %12 = vector.load %arg6[%c0_11, %c0_12] : memref<32x32xf32, #tpu.memory_space<vmem>>, vector<32x32xf32>
    %cst_13 = arith.constant dense<0.000000e+00> : vector<8x32xf32>
    %13 = tpu.matmul %11, %12, %cst_13 {dimension_numbers = #tpu.dot_dimension_numbers<[1], [0], [0], [1], [0, 0, 1, 1], [], []>} : vector<8x32xf32>, vector<32x32xf32>, vector<8x32xf32> -> vector<8x32xf32>
    %c0_14 = arith.constant 0 : index
    %c0_15 = arith.constant 0 : index
    %14 = vector.load %arg7[%c0_14, %c0_15] : memref<1x32xf32, #tpu.memory_space<vmem>>, vector<1x32xf32>
    %15 = vector.broadcast %14 : vector<1x32xf32> to vector<8x32xf32>
    %16 = arith.addf %13, %15 : vector<8x32xf32>
    %cst_16 = arith.constant 0.000000e+00 : f32
    %17 = vector.broadcast %cst_16 : f32 to vector<8x32xf32>
    %18 = arith.maximumf %16, %17 : vector<8x32xf32>
    %c0_17 = arith.constant 0 : index
    %c0_18 = arith.constant 0 : index
    %19 = vector.load %arg8[%c0_17, %c0_18] : memref<32x32xf32, #tpu.memory_space<vmem>>, vector<32x32xf32>
    %cst_19 = arith.constant dense<0.000000e+00> : vector<8x32xf32>
    %20 = tpu.matmul %18, %19, %cst_19 {dimension_numbers = #tpu.dot_dimension_numbers<[1], [0], [0], [1], [0, 0, 1, 1], [], []>} : vector<8x32xf32>, vector<32x32xf32>, vector<8x32xf32> -> vector<8x32xf32>
    %c0_20 = arith.constant 0 : index
    %c0_21 = arith.constant 0 : index
    %21 = vector.load %arg9[%c0_20, %c0_21] : memref<1x32xf32, #tpu.memory_space<vmem>>, vector<1x32xf32>
    %22 = vector.broadcast %21 : vector<1x32xf32> to vector<8x32xf32>
    %23 = arith.addf %20, %22 : vector<8x32xf32>
    %cst_22 = arith.constant 0.000000e+00 : f32
    %24 = vector.broadcast %cst_22 : f32 to vector<8x32xf32>
    %25 = arith.maximumf %23, %24 : vector<8x32xf32>
    %c0_23 = arith.constant 0 : index
    %c0_24 = arith.constant 0 : index
    %26 = vector.load %arg10[%c0_23, %c0_24] : memref<1x32xf32, #tpu.memory_space<vmem>>, vector<1x32xf32>
    %cst_25 = arith.constant dense<0.000000e+00> : vector<1x8xf32>
    %27 = tpu.matmul %26, %25, %cst_25 {dimension_numbers = #tpu.dot_dimension_numbers<[1], [1], [0], [0], [0, 0, 1, 0], [], []>} : vector<1x32xf32>, vector<8x32xf32>, vector<1x8xf32> -> vector<1x8xf32>
    %c0_26 = arith.constant 0 : index
    %c0_27 = arith.constant 0 : index
    %28 = vector.load %arg11[%c0_26, %c0_27] : memref<1x1xf32, #tpu.memory_space<vmem>>, vector<1x1xf32>
    %29 = vector.broadcast %28 : vector<1x1xf32> to vector<1x8xf32>
    %30 = arith.addf %27, %29 : vector<1x8xf32>
    %c0_28 = arith.constant 0 : index
    %c0_29 = arith.constant 0 : index
    %31 = vector.load %arg12[%c0_28, %c0_29] : memref<1x8xf32, #tpu.memory_space<vmem>>, vector<1x8xf32>
    tpu.vector_store %arg12[%c0_28, %c0_29], %30 {strides = array<i32>} : memref<1x8xf32, #tpu.memory_space<vmem>>, vector<1x8xf32>,
    return
  }
  func.func @transform_0(%arg0: i32) -> (i32, i32) {
    %c0_i32 = arith.constant 0 : i32
    %c0_i32_0 = arith.constant 0 : i32
    return %arg0, %c0_i32 : i32, i32
  }
  func.func @transform_1(%arg0: i32) -> (i32, i32) {
    %c0_i32 = arith.constant 0 : i32
    %c0_i32_0 = arith.constant 0 : i32
    return %arg0, %c0_i32 : i32, i32
  }
  func.func @transform_2(%arg0: i32) -> (i32, i32) {
    %c0_i32 = arith.constant 0 : i32
    %c0_i32_0 = arith.constant 0 : i32
    %c0_i32_1 = arith.constant 0 : i32
    return %c0_i32, %c0_i32_0 : i32, i32
  }
  func.func @transform_3(%arg0: i32) -> (i32, i32) {
    %c0_i32 = arith.constant 0 : i32
    %c0_i32_0 = arith.constant 0 : i32
    %c0_i32_1 = arith.constant 0 : i32
    return %c0_i32, %c0_i32_0 : i32, i32
  }
  func.func @transform_4(%arg0: i32) -> (i32, i32) {
    %c0_i32 = arith.constant 0 : i32
    %c0_i32_0 = arith.constant 0 : i32
    %c0_i32_1 = arith.constant 0 : i32
    return %c0_i32, %c0_i32_0 : i32, i32
  }
  func.func @transform_5(%arg0: i32) -> (i32, i32) {
    %c0_i32 = arith.constant 0 : i32
    %c0_i32_0 = arith.constant 0 : i32
    %c0_i32_1 = arith.constant 0 : i32
    return %c0_i32, %c0_i32_0 : i32, i32
  }
  func.func @transform_6(%arg0: i32) -> (i32, i32) {
    %c0_i32 = arith.constant 0 : i32
    %c0_i32_0 = arith.constant 0 : i32
    %c0_i32_1 = arith.constant 0 : i32
    return %c0_i32, %c0_i32_0 : i32, i32
  }
  func.func @transform_7(%arg0: i32) -> (i32, i32) {
    %c0_i32 = arith.constant 0 : i32
    %c0_i32_0 = arith.constant 0 : i32
    %c0_i32_1 = arith.constant 0 : i32
    return %c0_i32, %c0_i32_0 : i32, i32
  }
  func.func @transform_8(%arg0: i32) -> (i32, i32) {
    %c0_i32 = arith.constant 0 : i32
    %c0_i32_0 = arith.constant 0 : i32
    %c0_i32_1 = arith.constant 0 : i32
    return %c0_i32, %c0_i32_0 : i32, i32
  }
  func.func @transform_9(%arg0: i32) -> (i32, i32) {
    %c0_i32 = arith.constant 0 : i32
    %c0_i32_0 = arith.constant 0 : i32
    %c0_i32_1 = arith.constant 0 : i32
    return %c0_i32, %c0_i32_0 : i32, i32
  }
  func.func @transform_10(%arg0: i32) -> (i32, i32) {
    %c0_i32 = arith.constant 0 : i32
    %c0_i32_0 = arith.constant 0 : i32
    %c0_i32_1 = arith.constant 0 : i32
    return %c0_i32, %c0_i32_0 : i32, i32
  }
  func.func @transform_11(%arg0: i32) -> (i32, i32) {
    %c0_i32 = arith.constant 0 : i32
    %c0_i32_0 = arith.constant 0 : i32
    return %c0_i32, %arg0 : i32, i32
  }
}

</mosaic_0001>

<bundles_post_ra>
// kernel: critic_forward.1
= control target key start
LH: loop header
LB: loop body
LE: loop exit
PB: predicated region body
PF: predicated region fallthrough
CT: control target
= control target key end

     0   :  { %s617_s0 = inlined_call_operand.hbm [shape: f32[8,16], index: 0, kind: input, shape index: {}]   ;;  %s618_s1 = inlined_call_operand.hbm [shape: f32[8,8], index: 1, kind: input, shape index: {}]   ;;  %s619_s2 = inlined_call_operand.hbm [shape: f32[16,32], index: 2, kind: input, shape index: {}]   ;;  %s620_s3 = inlined_call_operand.hbm [shape: f32[8,32], index: 3, kind: input, shape index: {}]   ;;  %s621_s4 = inlined_call_operand.vmem [shape: f32[1,32], index: 4, kind: input, shape index: {}]   ;;  %s622_s5 = inlined_call_operand.hbm [shape: f32[32,32], index: 5, kind: input, shape index: {}]   ;;  %s623_s6 = inlined_call_operand.vmem [shape: f32[1,32], index: 6, kind: input, shape index: {}]   ;;  %s624_s7 = inlined_call_operand.hbm [shape: f32[32,32], index: 7, kind: input, shape index: {}]   ;;  %s625_s8 = inlined_call_operand.vmem [shape: f32[1,32], index: 8, kind: input, shape index: {}]   ;;  %s626_s9 = inlined_call_operand.vmem [shape: f32[1,32], index: 9, kind: input, shape index: {}]   ;;  %s627_s10 = inlined_call_operand.<no memory space> [shape: f32[1,1], index: 10, kind: input, shape index: {}]   ;;  %s628_s11 = inlined_call_operand.hbm [shape: f32[1,8], index: 11, kind: output, shape index: {}]  }
   0x1   :  { %v16_v0 = vstv %s627_s10 }
   0x2   :  { %17 = vst [vmem:[#allocation2] sm:$0x1] %v16_v0 }
   0x3   :  { %18 = vsyncpa [#allocation4], 0 }
   0x4   :  { %19 = vsyncpa [#allocation7], 0 }
   0x5   :  { %20 = vsyncpa [#allocation10], 0 }
   0x6   :  { %21 = vsyncpa [#allocation13], 0  ;;  %s39_s21 = sshll.u32 %s618_s1, 4  ;;  %s40_s21 = int_to_ptr.hbm [resolvable:$true] %s39_s21 }
   0x7   :  { %22 = vsyncpa [#allocation5], 0  ;;  %s507_s22 = smov [#allocation6]   ;;  %s63_s26 = sshll.u32 %s620_s3, 4  ;;  %s64_s26 = int_to_ptr.hbm [resolvable:$true] %s63_s26 }
   0x8   :  { %s41_s23 = sshll.u32 %s507_s22, 4  ;;  %s508_s10 = smov [#allocation9]   ;;  %s42_s23 = int_to_ptr.vmem [resolvable:$true] %s41_s23 }
   0x9   :  { %44 = dma.hbm_to_vmem [thread:$0]  %s40_s21, 128, %s42_s23, [#allocation7]  }
   0xa   :  { %s65_s27 = sshll.u32 %s508_s10, 4  ;;  %s28_s30 = sshll.u32 %s617_s0, 4  ;;  %s66_s27 = int_to_ptr.vmem [resolvable:$true] %s65_s27  ;;  %s29_s30 = int_to_ptr.hbm [resolvable:$true] %s28_s30 }
   0xb   :  { %68 = dma.hbm_to_vmem [thread:$0]  %s64_s26, 128, %s66_s27, [#allocation10]  }
   0xc   :  { %s49_s13 = sshll.u32 %s619_s2, 4  ;;  %s509_s14 = smov [#allocation3]   ;;  %s50_s13 = int_to_ptr.hbm [resolvable:$true] %s49_s13 }
   0xd   :  { %s30_s15 = sshll.u32 %s509_s14, 4  ;;  %s510_s3 = smov [#allocation8]   ;;  %s31_s15 = int_to_ptr.vmem [resolvable:$true] %s30_s15 }
   0xe   :  { %33 = dma.hbm_to_vmem [thread:$0]  %s29_s30, 128, %s31_s15, [#allocation4]  }
   0xf   :  { %s51_s16 = sshll.u32 %s510_s3, 4  ;;  %s511_s17 = smov 128   ;;  %s52_s16 = int_to_ptr.vmem [resolvable:$true] %s51_s16 }
  0x10   :  { %s512_s18 = smov 8   ;;  %s75_s20 = sshll.u32 %s622_s5, 4  ;;  %s76_s20 = int_to_ptr.hbm [resolvable:$true] %s75_s20 }
  0x11   :  { %57 = dma.hbm_to_vmem [thread:$0]  %s50_s13, 256, %s52_s16, [#allocation7], %s511_s17, %s511_s17, %s512_s18  }
  0x12   :  { %s513_s21 = smov [#allocation11]   ;;  %s90_s24 = sshll.u32 %s624_s7, 4  ;;  %s91_s24 = int_to_ptr.hbm [resolvable:$true] %s90_s24 }
  0x13   :  { %s77_s22 = sshll.u32 %s513_s21, 4  ;;  %s514_s25 = smov [#allocation12]   ;;  %s78_s22 = int_to_ptr.vmem [resolvable:$true] %s77_s22 }
  0x14   :  { %83 = dma.hbm_to_vmem [thread:$0]  %s76_s20, 512, %s78_s22, [#allocation10], %s511_s17, %s511_s17, %s512_s18  }
  0x15   :  { %s92_s26 = sshll.u32 %s514_s25, 4  ;;  %s93_s26 = int_to_ptr.vmem [resolvable:$true] %s92_s26 }
  0x16   :  { %98 = dma.hbm_to_vmem [thread:$0]  %s91_s24, 512, %s93_s26, [#allocation13], %s511_s17, %s511_s17, %s512_s18  }
  0x17   :  { %497 = dma.done.wait [#allocation4], 128  }
  0x18   :  { %498 = vsyncadd [#allocation4], 4294967168 }
  0x19   :  { %499 = dma.done.wait [#allocation7], 384  }
  0x1a   :  { %500 = vsyncadd [#allocation7], 4294966912 }
  0x1b   :  { %501 = dma.done.wait [#allocation10], 640  }
  0x1c   :  { %502 = vsyncadd [#allocation10], 4294966656 }
  0x1d   :  { %503 = dma.done.wait [#allocation13], 512  }
  0x1e   :  { %504 = vsyncadd [#allocation13], 4294966784  ;;  %vm134_vm0 = vcmask 64512   ;;  %v132_v1 = vld [vmem:[#allocation8 + $0x8] sm:$0xff]  ;;  %v133_v2 = vld [vmem:[#allocation9] sm:$0xff]  ;;  %vm158_vm1 = vcmask 130048  }
  0x1f   :  { %v131_v3 = vld [vmem:[#allocation8] sm:$0xff]  ;;  %176 = vmatpush.msra.mxu1 %v132_v1  ;;  %153 = vmatpush.msra.mxu0 %v133_v2  ;;  %v130_v4 = vld [vmem:[#allocation6] sm:$0xff]  ;;  %v129_v5 = vld [vmem:[#allocation3] sm:$0xff]  ;;  %vm196_vm2 = vcmask 261120   ;;  %v515_v25 = vmov 0   ;;  %s516_s30 = smov [#allocation14]  }
  0x20   :  { %309 = vmatmul.msk.f32.vlgmr.msra.gmra.mxu0 %vm134_vm0, %v130_v4  ;;  %v191_v6 = vld [vmem:[#allocation11 + $0x18] sm:$0xff]  ;;  %v190_v7 = vld [vmem:[#allocation11 + $0x10] sm:$0xff]  ;;  %v189_v8 = vld [vmem:[#allocation11 + $0x8] sm:$0xff]  ;;  %325 = vset.pattern.permute.xlu0 %v515_v25  ;;  %s294_s1 = sshll.u32 %s516_s30, 4  ;;  %s296_s14 = sshll.u32 %s628_s11, 4  ;;  %vm287_vm3 = vcmask 57344   ;;  %s295_s1 = int_to_ptr.vmem [resolvable:$true] %s294_s1  ;;  %s297_s14 = int_to_ptr.hbm [resolvable:$true] %s296_s14 }
  0x21   :  { %177 = vmatpush.msra.mxu1 %v131_v3  ;;  %212 = vmatpush.msra.mxu2 %v191_v6  ;;  %v188_v9 = vld [vmem:[#allocation11] sm:$0xff]  ;;  %v224_v10 = vld [vmem:[#allocation12 + $0x18] sm:$0xff]  ;;  %v326_v12 = vld [vmem:[%s621_s4] ss:$0 sm:$0xff] }
  0x22   :  { %310 = vmatmul.msk.f32.vlgmr.msra.gmra.mxu1 %vm158_vm1, %v129_v5  ;;  %244 = vmatpush.msra.mxu3 %v224_v10  ;;  %v223_v17 = vld [vmem:[#allocation12 + $0x10] sm:$0xff]  ;;  %v222_v18 = vld [vmem:[#allocation12 + $0x8] sm:$0xff]  ;;  %v221_v19 = vld [vmem:[#allocation12] sm:$0xff] }
  0x23   :  { %213 = vmatpush.msra.mxu2 %v190_v7  ;;  %v327_v20 = vld [vmem:[%s623_s6] ss:$0 sm:$0xff] }
  0x24   :  { %245 = vmatpush.msra.mxu3 %v223_v17  ;;  %v254_v24 = vld [vmem:[#allocation2] sm:$0x1] }
  0x25   :  { %214 = vmatpush.msra.mxu2 %v189_v8  ;;  %257 = vperm.xlu0 %325, %v254_v24   ;;  %v328_v26 = vld [vmem:[%s625_s8] ss:$0 sm:$0xff] }
  0x26   :  { %246 = vmatpush.msra.mxu3 %v222_v18  ;;  %v253_v30 = vld [vmem:[%s626_s9] sm:$0x1] }
  0x27   :  { %215 = vmatpush.msra.mxu2 %v188_v9 }
  0x28   :  { %247 = vmatpush.msra.mxu3 %v221_v19 }
  0x97   :  { %v258_v31 = vpop.permute.xlu0 %257 }
  0x98   :  { %v260_v32 = vperm.slane %v258_v31, 0 }
  0x9d   :  { %v155_v11 = vpop.f32.mrf.mxu0 }
  0x9f   :  { %v179_v13 = vpop.f32.mrf.mxu1 }
  0xa0   :  { %v180_v14 = vadd.f32 %v179_v13, %v155_v11 }
  0xa2   :  { %v186_v15 = vadd.f32 %v326_v12, %v180_v14 }
  0xa4   :  { %v187_v16 = vmax.f32 %v186_v15, 0.0 }
  0xa6   :  { %311 = vmatmul.msk.f32.vlgmr.msra.gmra.mxu2 %vm196_vm2, %v187_v16 }
 0x129   :  { %v217_v21 = vpop.f32.mrf.mxu2 }
 0x12a   :  { %v218_v22 = vadd.f32 %v327_v20, %v217_v21 }
 0x12c   :  { %v220_v23 = vmax.f32 %v218_v22, 0.0 }
 0x12e   :  { %312 = vmatmul.msk.f32.vlgmr.msra.gmra.mxu3 %vm196_vm2, %v220_v23 }
 0x1b1   :  { %v249_v27 = vpop.f32.mrf.mxu3 }
 0x1b2   :  { %v250_v28 = vadd.f32 %v328_v26, %v249_v27 }
 0x1b4   :  { %v252_v29 = vmax.f32 %v250_v28, 0.0 }
 0x1b6   :  { %313 = vmatpush.xpose.msk.msrb.mxu0 %vm196_vm2, %v252_v29 }
 0x1b9   :  { %314 = vmatmul.msk.f32.vlgmr.msrb.gmra.mxu0 %vm196_vm2, %v253_v30 }
 0x236   :  { %v284_v33 = vpop.f32.mrf.mxu0 }
 0x237   :  { %v285_v34 = vadd.f32 %v284_v33, %v260_v32 }
 0x239   :  { %288 = vst.msk [vmem:[#allocation14] sm:$0x1] %vm287_vm3, %v285_v34 }
 0x23a   :  { %299 = dma.vmem_to_hbm [thread:$0]  %s295_s1, 16, %s297_s14, [#allocation5]  }
 0x23b   :  { %505 = dma.done.wait [#allocation5], 16  }
 0x23c   :  { %506 = vsyncadd [#allocation5], 4294967280 }
 0x23d   :  { %304 = vsyncpa [#allocation4], 1 }
 0x23e   :  { %305 = vsyncpa [#allocation7], 1 }
 0x23f   :  { %306 = vsyncpa [#allocation10], 1 }
 0x240   :  { %307 = vsyncpa [#allocation13], 1 }
 0x241   :  { %308 = vsyncpa [#allocation5], 1 }

</bundles_post_ra>
